<compile_context>
chip_gen: v5e
topology: v5e:2x2
jax: 0.10.0
libtpu: 0.0.40
codegen_flags: <defaults>
</compile_context>

<pallas_src>
import functools

import jax
import jax.numpy as jnp
from jax import lax
from jax.experimental import pallas as pl
from jax.experimental.pallas import tpu as pltpu

LANE = 128
SUBLANE = 8


def _num_tensorcores():
    """Leading grid-axis size: 2 only on 2-TensorCore chips (v7x), else 1."""
    try:
        kind = jax.devices()[0].device_kind.lower()
    except Exception:
        return 1
    return 2 if "v7" in kind else 1


def _rmse_partial_kernel(dims_ref, x_ref, y_ref, o_ref, acc_ref, *, tile_m):
    # dims_ref : SMEM scalar prefetch; dims_ref[0] == n_elems (true element count).
    # x_ref/y_ref : (tile_m, 128) VMEM tiles in the operands' native dtype.
    # o_ref    : (1, 8, 128) per-core output block (same block across the
    #            reduction axis; written once in the epilogue with the raw acc).
    # acc_ref  : (8, 128) f32 VMEM accumulator (one vreg).
    core = pl.program_id(0)
    i = pl.program_id(1)
    blocks_per_core = pl.num_programs(1)
    tile_elems = tile_m * LANE

    @pl.when(i == 0)
    def _():
        acc_ref[...] = jnp.zeros_like(acc_ref)

    # UNCLAMPED global block id -> elements remaining from this block's start.
    # Clamped / out-of-range blocks get elems_remaining <= 0 and mask to zero.
    global_block = core * blocks_per_core + i
    elems_remaining = dims_ref[0] - global_block * tile_elems

    def sq_diff():
        # Cast in-kernel (v5e has no bf16 VPU); inputs stream in native dtype.
        d = x_ref[...].astype(jnp.float32) - y_ref[...].astype(jnp.float32)
        return d * d

    def accumulate(sq):
        if tile_m % SUBLANE == 0:
            # VPU tree reduce into one (8, 128) vreg: the reshape is
            # (8,128)-tile aligned (no relayout) and the axis-0 reduce is plain
            # vreg adds — no full-tile accumulator read-modify-write.
            acc_ref[...] += jnp.sum(
                sq.reshape(tile_m // SUBLANE, SUBLANE, LANE), axis=0)
        else:
            # Tiny inputs only (fewer than 8 rows total).
            acc_ref[0:1, :] += jnp.sum(sq, axis=0, keepdims=True)

    # Hot path: full interior block, no mask math at all.
    @pl.when(elems_remaining >= tile_elems)
    def _():
        accumulate(sq_diff())

    # Cold path (tail / clamped block): element-level mask against n_elems.
    @pl.when(elems_remaining < tile_elems)
    def _():
        row_ids = lax.broadcasted_iota(jnp.int32, (tile_m, LANE), 0)
        lane_ids = lax.broadcasted_iota(jnp.int32, (tile_m, LANE), 1)
        in_bounds = (row_ids * LANE + lane_ids) < elems_remaining
        accumulate(jnp.where(in_bounds, sq_diff(), 0.0))

    @pl.when(i == blocks_per_core - 1)
    def _():
        o_ref[0] = acc_ref[...]


def rmse_loss(x, y, *, tile_bytes=1 << 20):
    """Pallas equivalent of torch.sqrt(F.mse_loss(x, y)). Returns an f32 scalar."""
    assert x.shape == y.shape, "x and y must have the same shape"
    n_elems = int(x.size)
    assert 0 < n_elems < 2**31

    # Flatten in NATIVE dtype (free metadata reshape for contiguous arrays).
    xf = jnp.ravel(x)
    yf = jnp.ravel(y)

    # Pad ONLY when the element count is not a multiple of one lane row (128);
    # the in-kernel element mask makes the zero pad semantically irrelevant and
    # removes the old pad-to-1024 HBM copy for all typical DL tensor sizes.
    # TODO(synk): handle the <128-element remainder in plain JAX to avoid even
    # this rare full-array pad copy.
    n_pad = (-n_elems) % LANE
    if n_pad:
        xf = jnp.pad(xf, (0, n_pad))
        yf = jnp.pad(yf, (0, n_pad))
    m_rows = (n_elems + n_pad) // LANE

    x2d = xf.reshape(m_rows, LANE)
    y2d = yf.reshape(m_rows, LANE)

    # ~1 MiB per input tile per pipeline buffer: tile_m = 2048 rows (f32),
    # 4096 rows (bf16). 2 inputs x 2 buffers ~= 4 MiB (+4 KiB acc) — under the
    # default scoped-VMEM limits on v5e/v6e/v7x, no vmem_limit_bytes needed.
    itemsize = max(jnp.dtype(x.dtype).itemsize, jnp.dtype(y.dtype).itemsize)
    tile_m = max(SUBLANE, (tile_bytes // (LANE * itemsize)) // SUBLANE * SUBLANE)
    if m_rows < SUBLANE:
        tile_m_eff = m_rows                                   # block == full dim
    else:
        tile_m_eff = min(tile_m, (m_rows // SUBLANE) * SUBLANE)  # multiple of 8

    num_cores = _num_tensorcores()
    num_blocks = pl.cdiv(m_rows, tile_m_eff)
    blocks_per_core = pl.cdiv(num_blocks, num_cores)

    def in_index_map(c, i, dims):
        # Clamp blocks past the end (odd split / tiny inputs); the in-kernel
        # element mask zeroes their contribution.
        blk = jnp.minimum(c * blocks_per_core + i, num_blocks - 1)
        return (blk, 0)

    dims = jnp.array([n_elems], dtype=jnp.int32)
    kernel = functools.partial(_rmse_partial_kernel, tile_m=tile_m_eff)

    def build(dim_sems):
        return pl.pallas_call(
            kernel,
            out_shape=jax.ShapeDtypeStruct((num_cores, SUBLANE, LANE), jnp.float32),
            grid_spec=pltpu.PrefetchScalarGridSpec(
                num_scalar_prefetch=1,
                grid=(num_cores, blocks_per_core),
                in_specs=[
                    pl.BlockSpec((tile_m_eff, LANE), in_index_map),
                    pl.BlockSpec((tile_m_eff, LANE), in_index_map),
                ],
                out_specs=pl.BlockSpec((1, SUBLANE, LANE),
                                       lambda c, i, dims: (c, 0, 0)),
                scratch_shapes=[pltpu.VMEM((SUBLANE, LANE), jnp.float32)],
            ),
            compiler_params=pltpu.CompilerParams(dimension_semantics=dim_sems),
        )

    if num_cores > 1:
        # v7x: ask for a real TensorCore split; fall back to plain "parallel"
        # if CORE_PARALLEL is rejected on this jax/libtpu combination.
        sem_options = ((pltpu.CORE_PARALLEL, pltpu.ARBITRARY),
                       ("parallel", "arbitrary"))
    else:
        sem_options = (("arbitrary", "arbitrary"),)

    partials = None
    last_err = None
    for sems in sem_options:
        try:
            partials = build(sems)(dims, x2d, y2d)
            break
        except Exception as e:  # pragma: no cover - fallback path
            last_err = e
    if partials is None:
        raise last_err

    total = jnp.sum(partials)  # tiny (num_cores * 8 * 128) reduce in XLA
    return jnp.sqrt(total / jnp.float32(n_elems))


if __name__ == "__main__":
    key = jax.random.PRNGKey(0)
    kx, ky = jax.random.split(key)
    # NCHW-shaped example inputs (RMSELoss is shape-agnostic; any matching shapes work)
    x = jax.random.normal(kx, (2, 4, 16, 16), dtype=jnp.float32)
    y = jax.random.normal(ky, (2, 4, 16, 16), dtype=jnp.float32)

    loss = rmse_loss(x, y)
    jax.block_until_ready(loss)

    # Reference check against plain JAX
    ref = jnp.sqrt(jnp.mean((x - y) ** 2))
    assert jnp.allclose(loss, ref, rtol=1e-5, atol=1e-6), (loss, ref)
    print("KERNEL_OK")
</pallas_src>

<mosaic_0001>
module attributes {stable_mosaic.version = 11 : i64} {
  func.func @_rmse_partial_kernel(%arg0: i32, %arg1: i32, %arg2: memref<1xi32, #tpu.memory_space<smem>>, %arg3: memref<16x128xf32, #tpu.memory_space<vmem>>, %arg4: memref<16x128xf32, #tpu.memory_space<vmem>>, %arg5: memref<1x8x128xf32, #tpu.memory_space<vmem>>, %arg6: memref<8x128xf32, #tpu.memory_space<vmem>>) attributes {dimension_semantics = [#tpu.dimension_semantics<arbitrary>, #tpu.dimension_semantics<arbitrary>], iteration_bounds = array<i64: 1, 1>, scalar_prefetch = 1 : i64, scratch_operands = 1 : i64, tpu.core_type = #tpu.core_type<tc>, window_params = [{transform_indices = @transform_0, window_bounds = array<i64: 16, 128>}, {transform_indices = @transform_1, window_bounds = array<i64: 16, 128>}, {transform_indices = @transform_2, window_bounds = array<i64: 1, 8, 128>}]} {
    %c0_i32 = arith.constant 0 : i32
    %0 = arith.cmpi eq, %arg1, %c0_i32 : i32
    %1 = arith.extui %0 : i1 to i32
    %c0_i32_0 = arith.constant 0 : i32
    %2 = arith.cmpi ne, %1, %c0_i32_0 : i32
    scf.if %2 {
      %cst = arith.constant 0.000000e+00 : f32
      %17 = vector.broadcast %cst : f32 to vector<8x128xf32>
      %c0_7 = arith.constant 0 : index
      %c0_8 = arith.constant 0 : index
      %18 = vector.load %arg6[%c0_7, %c0_8] : memref<8x128xf32, #tpu.memory_space<vmem>>, vector<8x128xf32>
      tpu.vector_store %arg6[%c0_7, %c0_8], %17 {strides = array<i32>} : memref<8x128xf32, #tpu.memory_space<vmem>>, vector<8x128xf32>,
    } else {
    }
    %c1_i32 = arith.constant 1 : i32
    %3 = arith.muli %arg0, %c1_i32 : i32
    %4 = arith.addi %3, %arg1 : i32
    %c0 = arith.constant 0 : index
    %5 = memref.load %arg2[%c0] : memref<1xi32, #tpu.memory_space<smem>>
    %c2048_i32 = arith.constant 2048 : i32
    %6 = arith.muli %4, %c2048_i32 : i32
    %7 = arith.subi %5, %6 : i32
    %c2048_i32_1 = arith.constant 2048 : i32
    %8 = arith.cmpi sge, %7, %c2048_i32_1 : i32
    %9 = arith.extui %8 : i1 to i32
    %c0_i32_2 = arith.constant 0 : i32
    %10 = arith.cmpi ne, %9, %c0_i32_2 : i32
    scf.if %10 {
      %c0_7 = arith.constant 0 : index
      %c0_8 = arith.constant 0 : index
      %17 = vector.load %arg3[%c0_7, %c0_8] : memref<16x128xf32, #tpu.memory_space<vmem>>, vector<16x128xf32>
      %c0_9 = arith.constant 0 : index
      %c0_10 = arith.constant 0 : index
      %18 = vector.load %arg4[%c0_9, %c0_10] : memref<16x128xf32, #tpu.memory_space<vmem>>, vector<16x128xf32>
      %19 = arith.subf %17, %18 : vector<16x128xf32>
      %20 = arith.mulf %19, %19 : vector<16x128xf32>
      %c0_11 = arith.constant 0 : index
      %c0_12 = arith.constant 0 : index
      %21 = vector.load %arg6[%c0_11, %c0_12] : memref<8x128xf32, #tpu.memory_space<vmem>>, vector<8x128xf32>
      %22 = vector.shape_cast %20 : vector<16x128xf32> to vector<2x8x128xf32>
      %cst = arith.constant dense<0.000000e+00> : vector<8x128xf32>
      %23 = vector.multi_reduction <add>, %22, %cst [0] : vector<2x8x128xf32> to vector<8x128xf32>
      %24 = arith.addf %21, %23 : vector<8x128xf32>
      %c0_13 = arith.constant 0 : index
      %c0_14 = arith.constant 0 : index
      %25 = vector.load %arg6[%c0_13, %c0_14] : memref<8x128xf32, #tpu.memory_space<vmem>>, vector<8x128xf32>
      tpu.vector_store %arg6[%c0_13, %c0_14], %24 {strides = array<i32>} : memref<8x128xf32, #tpu.memory_space<vmem>>, vector<8x128xf32>,
    } else {
    }
    %c2048_i32_3 = arith.constant 2048 : i32
    %11 = arith.cmpi slt, %7, %c2048_i32_3 : i32
    %12 = arith.extui %11 : i1 to i32
    %c0_i32_4 = arith.constant 0 : i32
    %13 = arith.cmpi ne, %12, %c0_i32_4 : i32
    scf.if %13 {
      %17 = tpu.iota {dimensions = array<i32: 0>} : vector<16x128xi32>
      %18 = tpu.iota {dimensions = array<i32: 1>} : vector<16x128xi32>
      %c128_i32 = arith.constant 128 : i32
      %19 = vector.broadcast %c128_i32 : i32 to vector<16x128xi32>
      %20 = arith.muli %17, %19 : vector<16x128xi32>
      %21 = arith.addi %20, %18 : vector<16x128xi32>
      %22 = vector.broadcast %7 : i32 to vector<16x128xi32>
      %23 = arith.cmpi slt, %21, %22 : vector<16x128xi32>
      %c0_7 = arith.constant 0 : index
      %c0_8 = arith.constant 0 : index
      %24 = vector.load %arg3[%c0_7, %c0_8] : memref<16x128xf32, #tpu.memory_space<vmem>>, vector<16x128xf32>
      %c0_9 = arith.constant 0 : index
      %c0_10 = arith.constant 0 : index
      %25 = vector.load %arg4[%c0_9, %c0_10] : memref<16x128xf32, #tpu.memory_space<vmem>>, vector<16x128xf32>
      %26 = arith.subf %24, %25 : vector<16x128xf32>
      %27 = arith.mulf %26, %26 : vector<16x128xf32>
      %cst = arith.constant 0.000000e+00 : f32
      %28 = vector.broadcast %cst : f32 to vector<16x128xf32>
      %29 = arith.select %23, %27, %28 : vector<16x128xi1>, vector<16x128xf32>
      %c0_11 = arith.constant 0 : index
      %c0_12 = arith.constant 0 : index
      %30 = vector.load %arg6[%c0_11, %c0_12] : memref<8x128xf32, #tpu.memory_space<vmem>>, vector<8x128xf32>
      %31 = vector.shape_cast %29 : vector<16x128xf32> to vector<2x8x128xf32>
      %cst_13 = arith.constant dense<0.000000e+00> : vector<8x128xf32>
      %32 = vector.multi_reduction <add>, %31, %cst_13 [0] : vector<2x8x128xf32> to vector<8x128xf32>
      %33 = arith.addf %30, %32 : vector<8x128xf32>
      %c0_14 = arith.constant 0 : index
      %c0_15 = arith.constant 0 : index
      %34 = vector.load %arg6[%c0_14, %c0_15] : memref<8x128xf32, #tpu.memory_space<vmem>>, vector<8x128xf32>
      tpu.vector_store %arg6[%c0_14, %c0_15], %33 {strides = array<i32>} : memref<8x128xf32, #tpu.memory_space<vmem>>, vector<8x128xf32>,
    } else {
    }
    %c0_i32_5 = arith.constant 0 : i32
    %14 = arith.cmpi eq, %arg1, %c0_i32_5 : i32
    %15 = arith.extui %14 : i1 to i32
    %c0_i32_6 = arith.constant 0 : i32
    %16 = arith.cmpi ne, %15, %c0_i32_6 : i32
    scf.if %16 {
      %c0_7 = arith.constant 0 : index
      %c0_8 = arith.constant 0 : index
      %17 = vector.load %arg6[%c0_7, %c0_8] : memref<8x128xf32, #tpu.memory_space<vmem>>, vector<8x128xf32>
      %c0_9 = arith.constant 0 : index
      %c0_10 = arith.constant 0 : index
      %c0_11 = arith.constant 0 : index
      %18 = vector.load %arg5[%c0_9, %c0_10, %c0_11] : memref<1x8x128xf32, #tpu.memory_space<vmem>>, vector<1x8x128xf32>
      %19 = vector.shape_cast %18 : vector<1x8x128xf32> to vector<8x128xf32>
      %20 = vector.shape_cast %17 : vector<8x128xf32> to vector<1x8x128xf32>
      tpu.vector_store %arg5[%c0_9, %c0_10, %c0_11], %20 {strides = array<i32>} : memref<1x8x128xf32, #tpu.memory_space<vmem>>, vector<1x8x128xf32>,
    } else {
    }
    return
  }
  func.func @transform_0(%arg0: i32, %arg1: i32, %arg2: memref<1xi32, #tpu.memory_space<smem>>) -> (i32, i32) {
    %c1_i32 = arith.constant 1 : i32
    %0 = arith.muli %arg0, %c1_i32 : i32
    %1 = arith.addi %0, %arg1 : i32
    %c0_i32 = arith.constant 0 : i32
    %2 = arith.minsi %1, %c0_i32 : i32
    %c0_i32_0 = arith.constant 0 : i32
    %c0_i32_1 = arith.constant 0 : i32
    return %2, %c0_i32_0 : i32, i32
  }
  func.func @transform_1(%arg0: i32, %arg1: i32, %arg2: memref<1xi32, #tpu.memory_space<smem>>) -> (i32, i32) {
    %c1_i32 = arith.constant 1 : i32
    %0 = arith.muli %arg0, %c1_i32 : i32
    %1 = arith.addi %0, %arg1 : i32
    %c0_i32 = arith.constant 0 : i32
    %2 = arith.minsi %1, %c0_i32 : i32
    %c0_i32_0 = arith.constant 0 : i32
    %c0_i32_1 = arith.constant 0 : i32
    return %2, %c0_i32_0 : i32, i32
  }
  func.func @transform_2(%arg0: i32, %arg1: i32, %arg2: memref<1xi32, #tpu.memory_space<smem>>) -> (i32, i32, i32) {
    %c0_i32 = arith.constant 0 : i32
    %c0_i32_0 = arith.constant 0 : i32
    %c0_i32_1 = arith.constant 0 : i32
    return %arg0, %c0_i32, %c0_i32_0 : i32, i32, i32
  }
}

</mosaic_0001>

<bundles_post_ra>
// kernel: tpu_custom_call.1
= control target key start
LH: loop header
LB: loop body
LE: loop exit
PB: predicated region body
PF: predicated region fallthrough
CT: control target
= control target key end

     0   :  { %9 = vsyncpa [#allocation6], 0  ;;  %s278_s0 = inlined_call_operand.<no memory space> [shape: s32[1], index: 0, kind: input, shape index: {}]   ;;  %s279_s1 = inlined_call_operand.hbm [shape: f32[16,128], index: 1, kind: input, shape index: {}]   ;;  %s280_s2 = inlined_call_operand.hbm [shape: f32[16,128], index: 2, kind: input, shape index: {}]   ;;  %s281_s3 = inlined_call_operand.hbm [shape: f32[1,8,128], index: 3, kind: output, shape index: {}]  }
   0x1   :  { %10 = vsyncpa [#allocation9], 0 }
   0x2   :  { %11 = vsyncpa [#allocation7], 0  ;;  %s22_s14 = sshll.u32 %s279_s1, 4  ;;  %s234_s15 = smov [#allocation5]   ;;  %s23_s14 = int_to_ptr.hbm [resolvable:$true] %s22_s14 }
   0x3   :  { %s24_s16 = sshll.u32 %s234_s15, 4  ;;  %s41_s19 = sshll.u32 %s280_s2, 4  ;;  %s25_s16 = int_to_ptr.vmem [resolvable:$true] %s24_s16  ;;  %s42_s19 = int_to_ptr.hbm [resolvable:$true] %s41_s19 }
   0x4   :  { %s235_s20 = smov 128   ;;  %s236_s21 = smov 8  }
   0x5   :  { %30 = dma.hbm_to_vmem [thread:$0]  %s23_s14, 256, %s25_s16, [#allocation6], %s235_s20, %s235_s20, %s236_s21  }
   0x6   :  { %s237_s22 = smov [#allocation8]  }
   0x7   :  { %s43_s23 = sshll.u32 %s237_s22, 4  ;;  %s44_s23 = int_to_ptr.vmem [resolvable:$true] %s43_s23 }
   0x8   :  { %49 = dma.hbm_to_vmem [thread:$0]  %s42_s19, 256, %s44_s23, [#allocation9], %s235_s20, %s235_s20, %s236_s21  }
   0x9   :  { %228 = dma.done.wait [#allocation6], 256  }
   0xa   :  { %229 = vsyncadd [#allocation6], 4294967040 }
   0xb   :  { %230 = dma.done.wait [#allocation9], 256  }
   0xc   :  { %231 = vsyncadd [#allocation9], 4294967040  ;;  %v238_v0 = vmov 0.0   ;;  %p148_p0 = scmp.lt.s32.totalorder %s278_s0, 2048 }
   0xd   :  { %70 = vst [vmem:[#allocation2] sm:$0xff] %v238_v0 }
   0xe   :  { %78 = sbr.rel (%p148_p0) target bundleno = 30 (0x1e), region = 25 }
  0x13   :  { %v79_v1 = vld [vmem:[#allocation5] sm:$0xff]  ;;  %v80_v2 = vld [vmem:[#allocation5 + $0x8] sm:$0xff]  ;;  %v81_v3 = vld [vmem:[#allocation8] sm:$0xff] }
  0x14   :  { %v82_v4 = vld [vmem:[#allocation8 + $0x8] sm:$0xff]  ;;  %v83_v5 = vsub.f32 %v79_v1, %v81_v3 }
  0x15   :  { %v84_v6 = vsub.f32 %v80_v2, %v82_v4  ;;  %v87_v9 = vld [vmem:[#allocation2] sm:$0xff] }
  0x16   :  { %v85_v7 = vmul.f32 %v83_v5, %v83_v5 }
  0x17   :  { %v86_v8 = vmul.f32 %v84_v6, %v84_v6 }
  0x19   :  { %v88_v10 = vadd.f32 %v86_v8, %v85_v7 }
  0x1b   :  { %v89_v11 = vadd.f32 %v88_v10, %v87_v9 }
  0x1d   :  { %90 = vst [vmem:[#allocation2] sm:$0xff] %v89_v11 }
  0x1e PF:  { %p149_p1 = scmp.ge.s32.totalorder %s278_s0, 2048 }
  0x20   :  { %94 = sbr.rel (%p149_p1) target bundleno = 54 (0x36), region = 29 }
  0x25   :  { %v95_v12 = vlaneseq  ;;  %v107_v13 = vld [vmem:[#allocation5] sm:$0xff]  ;;  %v108_v14 = vld [vmem:[#allocation5 + $0x8] sm:$0xff]  ;;  %v109_v15 = vld [vmem:[#allocation8] sm:$0xff]  ;;  %v104_v23 = vstv %s278_s0 }
  0x26   :  { %v110_v16 = vld [vmem:[#allocation8 + $0x8] sm:$0xff]  ;;  %v111_v17 = vsub.f32 %v107_v13, %v109_v15 }
  0x27   :  { %v96_v18 = vshrl.u32 %v95_v12, 7  ;;  %v99_v19 = vand.u32 127, %v95_v12  ;;  %v112_v20 = vsub.f32 %v108_v14, %v110_v16  ;;  %v117_v31 = vld [vmem:[#allocation2] sm:$0xff] }
  0x28   :  { %v113_v24 = vmul.f32 %v111_v17, %v111_v17 }
  0x29   :  { %v97_v21 = vadd.s32 8, %v96_v18  ;;  %v100_v22 = vmul.u32 128, %v96_v18  ;;  %v114_v27 = vmul.f32 %v112_v20, %v112_v20 }
  0x2b   :  { %v101_v25 = vmul.u32 128, %v97_v21  ;;  %v102_v26 = vadd.s32 %v100_v22, %v99_v19 }
  0x2d   :  { %v103_v28 = vadd.s32 %v101_v25, %v99_v19  ;;  %vm105_vm0 = vcmp.lt.s32.totalorder %v102_v26, %v104_v23 }
  0x2e   :  { %v115_v29 = vsel %vm105_vm0, %v113_v24, 0.0 }
  0x2f   :  { %vm106_vm1 = vcmp.lt.s32.totalorder %v103_v28, %v104_v23 }
  0x30   :  { %v116_v30 = vsel %vm106_vm1, %v114_v27, 0.0 }
  0x31   :  { %v118_v32 = vadd.f32 %v116_v30, %v115_v29 }
  0x33   :  { %v119_v33 = vadd.f32 %v118_v32, %v117_v31 }
  0x35   :  { %120 = vst [vmem:[#allocation2] sm:$0xff] %v119_v33 }
  0x36 PF:  { %s133_s30 = sshll.u32 %s281_s3, 4  ;;  %s239_s0 = smov [#allocation10]   ;;  %s134_s30 = int_to_ptr.hbm [resolvable:$true] %s133_s30 }
  0x37   :  { %s131_s4 = sshll.u32 %s239_s0, 4  ;;  %s132_s4 = int_to_ptr.vmem [resolvable:$true] %s131_s4 }
  0x3c   :  { %v124_v34 = vld [vmem:[#allocation2] sm:$0xff] }
  0x3d   :  { %125 = vst [vmem:[#allocation10] sm:$0xff] %v124_v34 }
  0x3e   :  { %136 = dma.vmem_to_hbm [thread:$0]  %s132_s4, 128, %s134_s30, [#allocation7]  }
  0x3f   :  { %232 = dma.done.wait [#allocation7], 128  }
  0x40   :  { %233 = vsyncadd [#allocation7], 4294967168 }
  0x41   :  { %141 = vsyncpa [#allocation6], 1 }
  0x42   :  { %142 = vsyncpa [#allocation9], 1 }
  0x43   :  { %143 = vsyncpa [#allocation7], 1 }

</bundles_post_ra>
